<compile_context>
chip_gen: v5e
topology: v5e:2x2
jax: 0.10.0
libtpu: 0.0.40
codegen_flags: <defaults>
</compile_context>

<pallas_src>
import jax
import jax.numpy as jnp
import numpy as np
from jax.experimental import pallas as pl
from jax.experimental.pallas import tpu as pltpu


def _embedding_forward_kernel(c_ref, n_ref, u_ref, c_out_ref, n_out_ref, u_out_ref):
    # Pure pass-through: the module's forward returns the parameters unchanged.
    c_out_ref[...] = c_ref[...]
    n_out_ref[...] = n_ref[...]
    u_out_ref[...] = u_ref[...]


def embedding_layer_forward(c_embeddings, n_embeddings, u_embeddings, *, row_block=512):
    """Forward of EmbeddingLayer: returns (c_embeddings, n_embeddings, u_embeddings).

    c_embeddings, n_embeddings: (code_num, code_size)
    u_embeddings:               (code_num, graph_size)
    """
    code_num, code_size = c_embeddings.shape
    assert n_embeddings.shape == (code_num, code_size), n_embeddings.shape
    assert u_embeddings.shape[0] == code_num, u_embeddings.shape
    graph_size = u_embeddings.shape[1]

    # Row tile: the whole table when it is small (block == full array dims is
    # always legal), otherwise a multiple-of-8 row block sized to comfortably
    # fit v7x's smaller VMEM with double buffering (3 ins + 3 outs, 2 bufs).
    if code_num <= row_block:
        tb = code_num
    else:
        tb = row_block  # multiple of 8 -> satisfies the (8, 128) sublane rule

    grid = (pl.cdiv(code_num, tb),)

    out = pl.pallas_call(
        _embedding_forward_kernel,
        out_shape=(
            jax.ShapeDtypeStruct((code_num, code_size), c_embeddings.dtype),
            jax.ShapeDtypeStruct((code_num, code_size), n_embeddings.dtype),
            jax.ShapeDtypeStruct((code_num, graph_size), u_embeddings.dtype),
        ),
        grid_spec=pltpu.PrefetchScalarGridSpec(
            num_scalar_prefetch=0,
            grid=grid,
            in_specs=[
                pl.BlockSpec((tb, code_size), lambda i: (i, 0)),
                pl.BlockSpec((tb, code_size), lambda i: (i, 0)),
                pl.BlockSpec((tb, graph_size), lambda i: (i, 0)),
            ],
            out_specs=[
                pl.BlockSpec((tb, code_size), lambda i: (i, 0)),
                pl.BlockSpec((tb, code_size), lambda i: (i, 0)),
                pl.BlockSpec((tb, graph_size), lambda i: (i, 0)),
            ],
        ),
        compiler_params=pltpu.CompilerParams(
            dimension_semantics=("parallel",),
        ),
    )(c_embeddings, n_embeddings, u_embeddings)

    return out


def _xavier_uniform(key, shape, dtype=jnp.float32):
    """Matches torch.nn.init.xavier_uniform_ for a 2-D tensor (gain=1)."""
    fan_out, fan_in = shape[0], shape[1]
    bound = float(np.sqrt(6.0 / (fan_in + fan_out)))
    return jax.random.uniform(key, shape, dtype, minval=-bound, maxval=bound)


if __name__ == "__main__":
    # Small shapes consistent with the module.
    code_num, code_size, graph_size = 16, 32, 48

    key = jax.random.PRNGKey(0)
    kc, kn, ku = jax.random.split(key, 3)

    # Deterministic xavier-uniform-initialized parameters (done at "init" time,
    # outside the kernel, exactly like the PyTorch __init__).
    c_embeddings = _xavier_uniform(kc, (code_num, code_size))
    n_embeddings = _xavier_uniform(kn, (code_num, code_size))
    u_embeddings = _xavier_uniform(ku, (code_num, graph_size))

    c_out, n_out, u_out = embedding_layer_forward(c_embeddings, n_embeddings, u_embeddings)
    (c_out, n_out, u_out) = jax.block_until_ready((c_out, n_out, u_out))

    # Forward must return the parameters unchanged (bit-exact copy).
    assert c_out.shape == (code_num, code_size), c_out.shape
    assert n_out.shape == (code_num, code_size), n_out.shape
    assert u_out.shape == (code_num, graph_size), u_out.shape
    np.testing.assert_array_equal(np.asarray(c_out), np.asarray(c_embeddings))
    np.testing.assert_array_equal(np.asarray(n_out), np.asarray(n_embeddings))
    np.testing.assert_array_equal(np.asarray(u_out), np.asarray(u_embeddings))

    print("KERNEL_OK")
</pallas_src>

<mosaic_0001>
module attributes {stable_mosaic.version = 11 : i64} {
  func.func @_embedding_forward_kernel(%arg0: i32, %arg1: memref<16x32xf32, #tpu.memory_space<vmem>>, %arg2: memref<16x32xf32, #tpu.memory_space<vmem>>, %arg3: memref<16x48xf32, #tpu.memory_space<vmem>>, %arg4: memref<16x32xf32, #tpu.memory_space<vmem>>, %arg5: memref<16x32xf32, #tpu.memory_space<vmem>>, %arg6: memref<16x48xf32, #tpu.memory_space<vmem>>) attributes {dimension_semantics = [#tpu.dimension_semantics<parallel>], iteration_bounds = array<i64: 1>, scalar_prefetch = 0 : i64, scratch_operands = 0 : i64, tpu.core_type = #tpu.core_type<tc>, window_params = [{transform_indices = @transform_0, window_bounds = array<i64: 16, 32>}, {transform_indices = @transform_1, window_bounds = array<i64: 16, 32>}, {transform_indices = @transform_2, window_bounds = array<i64: 16, 48>}, {transform_indices = @transform_3, window_bounds = array<i64: 16, 32>}, {transform_indices = @transform_4, window_bounds = array<i64: 16, 32>}, {transform_indices = @transform_5, window_bounds = array<i64: 16, 48>}]} {
    %c0 = arith.constant 0 : index
    %c0_0 = arith.constant 0 : index
    %0 = vector.load %arg1[%c0, %c0_0] : memref<16x32xf32, #tpu.memory_space<vmem>>, vector<16x32xf32>
    %c0_1 = arith.constant 0 : index
    %c0_2 = arith.constant 0 : index
    %1 = vector.load %arg4[%c0_1, %c0_2] : memref<16x32xf32, #tpu.memory_space<vmem>>, vector<16x32xf32>
    tpu.vector_store %arg4[%c0_1, %c0_2], %0 {strides = array<i32>} : memref<16x32xf32, #tpu.memory_space<vmem>>, vector<16x32xf32>,
    %c0_3 = arith.constant 0 : index
    %c0_4 = arith.constant 0 : index
    %2 = vector.load %arg2[%c0_3, %c0_4] : memref<16x32xf32, #tpu.memory_space<vmem>>, vector<16x32xf32>
    %c0_5 = arith.constant 0 : index
    %c0_6 = arith.constant 0 : index
    %3 = vector.load %arg5[%c0_5, %c0_6] : memref<16x32xf32, #tpu.memory_space<vmem>>, vector<16x32xf32>
    tpu.vector_store %arg5[%c0_5, %c0_6], %2 {strides = array<i32>} : memref<16x32xf32, #tpu.memory_space<vmem>>, vector<16x32xf32>,
    %c0_7 = arith.constant 0 : index
    %c0_8 = arith.constant 0 : index
    %4 = vector.load %arg3[%c0_7, %c0_8] : memref<16x48xf32, #tpu.memory_space<vmem>>, vector<16x48xf32>
    %c0_9 = arith.constant 0 : index
    %c0_10 = arith.constant 0 : index
    %5 = vector.load %arg6[%c0_9, %c0_10] : memref<16x48xf32, #tpu.memory_space<vmem>>, vector<16x48xf32>
    tpu.vector_store %arg6[%c0_9, %c0_10], %4 {strides = array<i32>} : memref<16x48xf32, #tpu.memory_space<vmem>>, vector<16x48xf32>,
    return
  }
  func.func @transform_0(%arg0: i32) -> (i32, i32) {
    %c0_i32 = arith.constant 0 : i32
    %c0_i32_0 = arith.constant 0 : i32
    return %arg0, %c0_i32 : i32, i32
  }
  func.func @transform_1(%arg0: i32) -> (i32, i32) {
    %c0_i32 = arith.constant 0 : i32
    %c0_i32_0 = arith.constant 0 : i32
    return %arg0, %c0_i32 : i32, i32
  }
  func.func @transform_2(%arg0: i32) -> (i32, i32) {
    %c0_i32 = arith.constant 0 : i32
    %c0_i32_0 = arith.constant 0 : i32
    return %arg0, %c0_i32 : i32, i32
  }
  func.func @transform_3(%arg0: i32) -> (i32, i32) {
    %c0_i32 = arith.constant 0 : i32
    %c0_i32_0 = arith.constant 0 : i32
    return %arg0, %c0_i32 : i32, i32
  }
  func.func @transform_4(%arg0: i32) -> (i32, i32) {
    %c0_i32 = arith.constant 0 : i32
    %c0_i32_0 = arith.constant 0 : i32
    return %arg0, %c0_i32 : i32, i32
  }
  func.func @transform_5(%arg0: i32) -> (i32, i32) {
    %c0_i32 = arith.constant 0 : i32
    %c0_i32_0 = arith.constant 0 : i32
    return %arg0, %c0_i32 : i32, i32
  }
}

</mosaic_0001>

<bundles_post_ra>
// kernel: tpu_custom_call.1
= control target key start
LH: loop header
LB: loop body
LE: loop exit
PB: predicated region body
PF: predicated region fallthrough
CT: control target
= control target key end

     0   :  { %11 = vsyncpa [#allocation3], 0  ;;  %s373_s0 = inlined_call_operand.hbm [shape: f32[16,32], index: 0, kind: input, shape index: {}]   ;;  %s374_s1 = inlined_call_operand.hbm [shape: f32[16,32], index: 1, kind: input, shape index: {}]   ;;  %s375_s2 = inlined_call_operand.hbm [shape: f32[16,48], index: 2, kind: input, shape index: {}]   ;;  %s376_s3 = inlined_call_operand.hbm [shape: f32[16,32], index: 3, kind: output, shape index: {0}]   ;;  %s377_s4 = inlined_call_operand.hbm [shape: f32[16,32], index: 4, kind: output, shape index: {1}]   ;;  %s378_s5 = inlined_call_operand.hbm [shape: f32[16,48], index: 5, kind: output, shape index: {2}]  }
   0x1   :  { %12 = vsyncpa [#allocation6], 0 }
   0x2   :  { %13 = vsyncpa [#allocation4], 0 }
   0x3   :  { %14 = vsyncpa [#allocation10], 0  ;;  %s32_s20 = sshll.u32 %s374_s1, 4  ;;  %s295_s21 = smov [#allocation5]   ;;  %s33_s20 = int_to_ptr.hbm [resolvable:$true] %s32_s20 }
   0x4   :  { %s34_s22 = sshll.u32 %s295_s21, 4  ;;  %s19_s25 = sshll.u32 %s373_s0, 4  ;;  %s35_s22 = int_to_ptr.vmem [resolvable:$true] %s34_s22  ;;  %s20_s25 = int_to_ptr.hbm [resolvable:$true] %s19_s25 }
   0x5   :  { %s296_s26 = smov 128   ;;  %s297_s27 = smov 8  }
   0x6   :  { %40 = dma.hbm_to_vmem [thread:$0]  %s33_s20, 256, %s35_s22, [#allocation6], %s296_s26, %s296_s26, %s297_s27  }
   0x7   :  { %s298_s28 = smov [#allocation2]   ;;  %s45_s1 = sshll.u32 %s375_s2, 4  ;;  %s46_s1 = int_to_ptr.hbm [resolvable:$true] %s45_s1 }
   0x8   :  { %s21_s29 = sshll.u32 %s298_s28, 4  ;;  %s299_s0 = smov [#allocation7]   ;;  %s22_s29 = int_to_ptr.vmem [resolvable:$true] %s21_s29 }
   0x9   :  { %27 = dma.hbm_to_vmem [thread:$0]  %s20_s25, 256, %s22_s29, [#allocation3], %s296_s26, %s296_s26, %s297_s27  }
   0xa   :  { %s47_s7 = sshll.u32 %s299_s0, 4  ;;  %s48_s7 = int_to_ptr.vmem [resolvable:$true] %s47_s7 }
   0xb   :  { %53 = dma.hbm_to_vmem [thread:$0]  %s46_s1, 256, %s48_s7, [#allocation6], %s296_s26, %s296_s26, %s297_s27  }
   0xc   :  { %287 = dma.done.wait [#allocation3], 256  }
   0xd   :  { %288 = vsyncadd [#allocation3], 4294967040 }
   0xe   :  { %289 = dma.done.wait [#allocation6], 512  }
   0xf   :  { %290 = vsyncadd [#allocation6], 4294966784  ;;  %s300_s8 = smov [#allocation9]   ;;  %s99_s11 = sshll.u32 %s377_s4, 4  ;;  %vm68_vm0 = vcmask 261120   ;;  %v71_v0 = vld [vmem:[#allocation5] sm:$0xff]  ;;  %s100_s11 = int_to_ptr.hbm [resolvable:$true] %s99_s11 }
  0x10   :  { %s97_s9 = sshll.u32 %s300_s8, 4  ;;  %s301_s12 = smov [#allocation8]   ;;  %v72_v1 = vld [vmem:[#allocation5 + $0x8] sm:$0xff]  ;;  %v66_v2 = vld [vmem:[#allocation2] sm:$0xff]  ;;  %73 = vst.msk [vmem:[#allocation9] sm:$0xff] %vm68_vm0, %v71_v0  ;;  %v67_v3 = vld [vmem:[#allocation2 + $0x8] sm:$0xff]  ;;  %s98_s9 = int_to_ptr.vmem [resolvable:$true] %s97_s9 }
  0x11   :  { %s84_s13 = sshll.u32 %s301_s12, 4  ;;  %s86_s16 = sshll.u32 %s376_s3, 4  ;;  %74 = vst.msk [vmem:[#allocation9 + $0x8] sm:$0xff] %vm68_vm0, %v72_v1  ;;  %v75_v4 = vld [vmem:[#allocation7] sm:$0xff]  ;;  %vm77_vm1 = vcmask 392192   ;;  %v76_v5 = vld [vmem:[#allocation7 + $0x8] sm:$0xff]  ;;  %s85_s13 = int_to_ptr.vmem [resolvable:$true] %s84_s13  ;;  %s87_s16 = int_to_ptr.hbm [resolvable:$true] %s86_s16 }
  0x12   :  { %s302_s17 = smov [#allocation11]   ;;  %s112_s4 = sshll.u32 %s378_s5, 4  ;;  %69 = vst.msk [vmem:[#allocation8] sm:$0xff] %vm68_vm0, %v66_v2  ;;  %s113_s4 = int_to_ptr.hbm [resolvable:$true] %s112_s4 }
  0x13   :  { %s110_s18 = sshll.u32 %s302_s17, 4  ;;  %70 = vst.msk [vmem:[#allocation8 + $0x8] sm:$0xff] %vm68_vm0, %v67_v3  ;;  %s111_s18 = int_to_ptr.vmem [resolvable:$true] %s110_s18 }
  0x14   :  { %105 = dma.vmem_to_hbm [thread:$0]  %s98_s9, 256, %s100_s11, [#allocation10], %s296_s26, %s296_s26, %s297_s27   ;;  %78 = vst.msk [vmem:[#allocation11] sm:$0xff] %vm77_vm1, %v75_v4 }
  0x15   :  { %92 = dma.vmem_to_hbm [thread:$0]  %s85_s13, 256, %s87_s16, [#allocation4], %s296_s26, %s296_s26, %s297_s27   ;;  %79 = vst.msk [vmem:[#allocation11 + $0x8] sm:$0xff] %vm77_vm1, %v76_v5 }
  0x16   :  { %118 = dma.vmem_to_hbm [thread:$0]  %s111_s18, 256, %s113_s4, [#allocation10], %s296_s26, %s296_s26, %s297_s27  }
  0x17   :  { %291 = dma.done.wait [#allocation4], 256  }
  0x18   :  { %292 = vsyncadd [#allocation4], 4294967040 }
  0x19   :  { %293 = dma.done.wait [#allocation10], 512  }
  0x1a   :  { %294 = vsyncadd [#allocation10], 4294966784 }
  0x1b   :  { %131 = vsyncpa [#allocation3], 1 }
  0x1c   :  { %132 = vsyncpa [#allocation6], 1 }
  0x1d   :  { %133 = vsyncpa [#allocation4], 1 }
  0x1e   :  { %134 = vsyncpa [#allocation10], 1 }

</bundles_post_ra>
